<compile_context>
chip_gen: v5e
topology: v5e:2x2
jax: 0.10.0
libtpu: 0.0.40
codegen_flags: <defaults>
</compile_context>

<pallas_src>
import jax
import jax.numpy as jnp
from jax import lax
from jax.experimental import pallas as pl
from jax.experimental.pallas import tpu as pltpu


def _make_rollout_kernel(z_size, f_size, hidden, out_size, n_steps, has_F):
    """Fused T-step LSTM rollout: single grid step, in-kernel time loop.

    Carried state is packed in one VMEM scratch buffer x_buf = [ z | F | h ]
    (so the gate matmul is a single dot against the stacked weight) plus a
    separate c_buf for the cell state.  Gate column order is [i, f, o, g].
    """
    Z, FSZ, H, T = z_size, f_size, hidden, n_steps
    d_in = Z + FSZ + H

    def kernel(*refs):
        if has_F:
            (z0_ref, h0_ref, c0_ref, f_all_ref,
             w_all_ref, b_ref, w_out_ref, b_out_ref,
             out_ref, h_out_ref, c_out_ref,
             x_buf, c_buf) = refs
        else:
            (z0_ref, h0_ref, c0_ref,
             w_all_ref, b_ref, w_out_ref, b_out_ref,
             out_ref, h_out_ref, c_out_ref,
             x_buf, c_buf) = refs
            f_all_ref = None

        B = x_buf.shape[0]

        # ---- loop-invariant loads & broadcasts (hoisted out of the time loop) ----
        w_all = w_all_ref[...]                      # (d_in, 4H), f32 or bf16
        w_out = w_out_ref[...]                      # (H, OUT)
        mm_dtype = w_all.dtype
        bias = jnp.broadcast_to(b_ref[...], (B, 4 * H))          # f32
        bias_out = jnp.broadcast_to(b_out_ref[...], (B, out_size))  # f32

        # ---- initialize packed carried state [ z | F | h ] and cell state ----
        x_buf[:, 0:Z] = z0_ref[...]
        x_buf[:, Z + FSZ:d_in] = h0_ref[...]
        c_buf[...] = c0_ref[...]

        def step(t, carry):
            if has_F:
                # Per-step external forcing slot (VMEM -> VMEM, tiny).
                x_buf[:, Z:Z + FSZ] = f_all_ref[t]

            x = x_buf[...]                          # (B, d_in) f32

            # Single fused MXU matmul for all four gates.
            gates = jnp.dot(x.astype(mm_dtype), w_all,
                            preferred_element_type=jnp.float32) + bias

            # Gate order [i, f, o, g]: one sigmoid pass over 3H cols, one tanh
            # pass over H cols (half the transcendental work of 2 x 4H passes).
            sig = jax.nn.sigmoid(gates[:, 0:3 * H])
            i_g = sig[:, 0 * H:1 * H]
            f_g = sig[:, 1 * H:2 * H]
            o_g = sig[:, 2 * H:3 * H]
            g_g = jnp.tanh(gates[:, 3 * H:4 * H])

            c1 = f_g * c_buf[...] + i_g * g_g
            h1 = o_g * jnp.tanh(c1)

            # Output layer (identity activation) + residual.
            out = (x[:, 0:Z]
                   + jnp.dot(h1.astype(mm_dtype), w_out,
                             preferred_element_type=jnp.float32)
                   + bias_out)

            # Store into the VMEM-resident (T, B, OUT) output block; HBM
            # writeback happens once, after the whole rollout.
            out_ref[t, :, :] = out.astype(out_ref.dtype)

            # Carry state for the next step, entirely in VMEM:
            # next cell / hidden state, autoregressive feedback next_z = out.
            c_buf[...] = c1
            x_buf[:, Z + FSZ:d_in] = h1
            x_buf[:, 0:Z] = out
            return carry

        lax.fori_loop(0, T, step, 0, unroll=True)

        # Final hidden / cell state written back once, at the end.
        h_out_ref[...] = x_buf[:, Z + FSZ:d_in].astype(h_out_ref.dtype)
        c_out_ref[...] = c_buf[...].astype(c_out_ref.dtype)

    return kernel


def rnn_rollout(z0, F_seq, h, params):
    """Fused T-step autoregressive rollout of the RNN module in one pallas_call.

    Each step applies exactly RNN.forward (default config) and feeds its output
    back as the next z.  T == 1 reproduces a single RNN.forward call.

    Args:
      z0:     (B, Z) initial latent state.
      F_seq:  (T, B, F_size) per-step external forcing (F_size may be 0).
      h:      None or (h0, c0), each (B, hidden).
      params: dict from init_params (stacked, gate-reordered, pre-transposed).
    Returns:
      (out_seq (T, B, Z), (hT, cT)).
    """
    B, Z = z0.shape
    T = F_seq.shape[0]
    FSZ = F_seq.shape[-1]
    H, OUT = params['w_out'].shape
    # residual=True (and the autoregressive feedback) require output_size == z_size.
    assert OUT == Z, "default RNNConfig path requires output_size == z_size"
    d_in = Z + FSZ + H
    assert params['w_all'].shape == (d_in, 4 * H)
    assert T >= 1
    has_F = FSZ > 0

    if h is None:
        h0 = jnp.zeros((B, H), jnp.float32)
        c0 = jnp.zeros((B, H), jnp.float32)
    else:
        h0, c0 = h

    def const_spec(shape):
        # Constant index_map -> DMA'd once, VMEM-resident for the whole rollout.
        nd = len(shape)
        return pl.BlockSpec(shape, lambda i, _nd=nd: (0,) * _nd)

    in_specs = [const_spec((B, Z)), const_spec((B, H)), const_spec((B, H))]
    inputs = [z0, h0, c0]
    if has_F:
        in_specs.append(const_spec((T, B, FSZ)))   # whole forcing sequence, one DMA
        inputs.append(F_seq)
    in_specs += [const_spec((d_in, 4 * H)), const_spec((1, 4 * H)),
                 const_spec((H, OUT)), const_spec((1, OUT))]
    inputs += [params['w_all'], params['b'], params['w_out'], params['b_out']]

    out_specs = (const_spec((T, B, OUT)),           # whole rollout, one writeback
                 const_spec((B, H)),
                 const_spec((B, H)))
    out_shapes = (jax.ShapeDtypeStruct((T, B, OUT), jnp.float32),
                  jax.ShapeDtypeStruct((B, H), jnp.float32),
                  jax.ShapeDtypeStruct((B, H), jnp.float32))

    kernel = _make_rollout_kernel(Z, FSZ, H, OUT, T, has_F)

    out_seq, hT, cT = pl.pallas_call(
        kernel,
        out_shape=out_shapes,
        grid_spec=pltpu.PrefetchScalarGridSpec(
            num_scalar_prefetch=0,
            grid=(1,),                              # time loop lives inside the kernel
            in_specs=in_specs,
            out_specs=out_specs,
            scratch_shapes=[pltpu.VMEM((B, d_in), jnp.float32),   # packed [z|F|h]
                            pltpu.VMEM((B, H), jnp.float32)],     # cell state
        ),
        compiler_params=pltpu.CompilerParams(
            dimension_semantics=("arbitrary",)),
    )(*inputs)

    return out_seq, (hT, cT)


def rnn_forward(z, F, h, params):
    """One RNN step — matches RNN.forward for the default RNNConfig."""
    F_seq = F[None]  # (1, B, F_size); F_size == 0 handled inside rnn_rollout
    out_seq, (h1, c1) = rnn_rollout(z, F_seq, h, params)
    return out_seq[0], (h1, c1)


def init_params(key, input_size, hidden, output_size, *, mm_dtype=jnp.float32):
    """Deterministic PyTorch-style uniform(-1/sqrt(H), 1/sqrt(H)) init.

    W_ih^T and W_hh^T are stacked along the input dim into a single fused gate
    weight `w_all` of shape (input_size + hidden, 4*hidden); biases pre-summed.
    Gate columns are reordered from PyTorch's [i, f, g, o] to [i, f, o, g] so
    the kernel can run one sigmoid pass over the first 3H columns.
    mm_dtype=bfloat16 stores the matmul weights in bf16 (v6e/v7x MXU path);
    biases and all elementwise math stay f32.
    """
    k = 1.0 / jnp.sqrt(jnp.float32(hidden))
    ks = jax.random.split(key, 6)
    u = lambda kk, shape: jax.random.uniform(kk, shape, jnp.float32, -k, k)
    w_ih = u(ks[0], (input_size, 4 * hidden))    # = W_ih^T
    w_hh = u(ks[1], (hidden, 4 * hidden))        # = W_hh^T
    b = u(ks[2], (1, 4 * hidden)) + u(ks[3], (1, 4 * hidden))  # b_ih + b_hh
    w_out = u(ks[4], (hidden, output_size))      # = W_out^T
    b_out = u(ks[5], (1, output_size))

    def reorder_gates(w):  # columns [i, f, g, o] -> [i, f, o, g]
        i, f, g, o = jnp.split(w, 4, axis=-1)
        return jnp.concatenate([i, f, o, g], axis=-1)

    w_all = reorder_gates(jnp.concatenate([w_ih, w_hh], axis=0))  # (in+H, 4H)
    b = reorder_gates(b)
    return dict(w_all=w_all.astype(mm_dtype), b=b,
                w_out=w_out.astype(mm_dtype), b_out=b_out)


def rnn_forward_ref(z, F, h, params):
    """Pure-JAX single-step reference (mirrors the PyTorch module; gate order
    and matmul precision match the kernel's path for the given params)."""
    B = z.shape[0]
    H = params['w_out'].shape[0]
    mm_dtype = params['w_all'].dtype
    h0, c0 = ((jnp.zeros((B, H), jnp.float32), jnp.zeros((B, H), jnp.float32))
              if h is None else h)
    if F.shape[-1] > 0:
        x = jnp.concatenate([z, F, h0], axis=-1)
    else:
        x = jnp.concatenate([z, h0], axis=-1)
    gates = jnp.dot(x.astype(mm_dtype), params['w_all'],
                    preferred_element_type=jnp.float32) + params['b']
    i, f, o, g = jnp.split(gates, 4, axis=-1)     # kernel gate order [i, f, o, g]
    i, f, o = jax.nn.sigmoid(i), jax.nn.sigmoid(f), jax.nn.sigmoid(o)
    g = jnp.tanh(g)
    c1 = f * c0 + i * g
    h1 = o * jnp.tanh(c1)
    out = z + (jnp.dot(h1.astype(mm_dtype), params['w_out'],
                       preferred_element_type=jnp.float32) + params['b_out'])
    return out, (h1, c1)


if __name__ == "__main__":
    # Small, forward-consistent shapes:
    #   z: (B=8, z_size=16), F: (B=8, F_size=4)  ->  LSTM input_size = 20
    #   rnn_hidden_size = 32, output_size = 16 (== z_size, so residual applies)
    #   T = 8 autoregressive rollout steps fused into one kernel invocation.
    B, Z, FSZ, HID, T = 8, 16, 4, 32, 8
    key = jax.random.PRNGKey(0)
    kz, kf, kp = jax.random.split(key, 3)

    z0 = jax.random.normal(kz, (B, Z), jnp.float32)
    F_seq = jax.random.normal(kf, (T, B, FSZ), jnp.float32)

    # TODO(synk): has_sigma2 (SigmaLayer), scaling_F, scale_dz != 1.0, GRU cell and
    # rnn_num_layers > 1 branches are disabled by the default RNNConfig and are not
    # implemented here.

    def rollout_ref(params):
        z_r, h_r = z0, None
        outs = []
        for t in range(T):
            z_r, h_r = rnn_forward_ref(z_r, F_seq[t], h_r, params)
            outs.append(z_r)
        return jnp.stack(outs, axis=0), h_r

    # --- f32 weights: exact-path check -------------------------------------------
    params = init_params(kp, input_size=Z + FSZ, hidden=HID, output_size=Z,
                         mm_dtype=jnp.float32)

    out1, (h1, c1) = rnn_forward(z0, F_seq[0], None, params)
    jax.block_until_ready((out1, h1, c1))
    out1_r, (h1_r, c1_r) = rnn_forward_ref(z0, F_seq[0], None, params)
    assert out1.shape == (B, Z) and h1.shape == (B, HID) and c1.shape == (B, HID)
    assert jnp.allclose(out1, out1_r, rtol=1e-5, atol=3e-5), "single-step output mismatch"
    assert jnp.allclose(h1, h1_r, rtol=1e-5, atol=3e-5), "single-step hidden mismatch"
    assert jnp.allclose(c1, c1_r, rtol=1e-5, atol=3e-5), "single-step cell mismatch"

    out_seq, (hT, cT) = rnn_rollout(z0, F_seq, None, params)
    jax.block_until_ready((out_seq, hT, cT))
    out_seq_r, (hT_r, cT_r) = rollout_ref(params)
    assert out_seq.shape == (T, B, Z)
    assert jnp.allclose(out_seq, out_seq_r, rtol=1e-4, atol=3e-4), "rollout output mismatch"
    assert jnp.allclose(hT, hT_r, rtol=1e-4, atol=3e-4), "rollout hidden mismatch"
    assert jnp.allclose(cT, cT_r, rtol=1e-4, atol=3e-4), "rollout cell mismatch"

    # --- bf16 weights (v6e/v7x MXU path): reference uses the same bf16 matmuls ----
    params_bf16 = init_params(kp, input_size=Z + FSZ, hidden=HID, output_size=Z,
                              mm_dtype=jnp.bfloat16)
    out_seq_b, (hT_b, cT_b) = rnn_rollout(z0, F_seq, None, params_bf16)
    jax.block_until_ready((out_seq_b, hT_b, cT_b))
    out_seq_br, (hT_br, cT_br) = rollout_ref(params_bf16)
    assert jnp.allclose(out_seq_b, out_seq_br, rtol=5e-3, atol=5e-3), "bf16 rollout output mismatch"
    assert jnp.allclose(hT_b, hT_br, rtol=5e-3, atol=5e-3), "bf16 rollout hidden mismatch"
    assert jnp.allclose(cT_b, cT_br, rtol=5e-3, atol=5e-3), "bf16 rollout cell mismatch"

    print("KERNEL_OK")
</pallas_src>

<mosaic_0001>
module attributes {stable_mosaic.version = 11 : i64} {
  func.func @kernel(%arg0: i32, %arg1: memref<8x16xf32, #tpu.memory_space<vmem>>, %arg2: memref<8x32xf32, #tpu.memory_space<vmem>>, %arg3: memref<8x32xf32, #tpu.memory_space<vmem>>, %arg4: memref<1x8x4xf32, #tpu.memory_space<vmem>>, %arg5: memref<52x128xf32, #tpu.memory_space<vmem>>, %arg6: memref<1x128xf32, #tpu.memory_space<vmem>>, %arg7: memref<32x16xf32, #tpu.memory_space<vmem>>, %arg8: memref<1x16xf32, #tpu.memory_space<vmem>>, %arg9: memref<1x8x16xf32, #tpu.memory_space<vmem>>, %arg10: memref<8x32xf32, #tpu.memory_space<vmem>>, %arg11: memref<8x32xf32, #tpu.memory_space<vmem>>, %arg12: memref<8x52xf32, #tpu.memory_space<vmem>>, %arg13: memref<8x32xf32, #tpu.memory_space<vmem>>) attributes {dimension_semantics = [#tpu.dimension_semantics<arbitrary>], iteration_bounds = array<i64: 1>, scalar_prefetch = 0 : i64, scratch_operands = 2 : i64, tpu.core_type = #tpu.core_type<tc>, window_params = [{pipeline_mode = #tpu.pipeline_mode<synchronous>, transform_indices = @transform_0, window_bounds = array<i64: 8, 16>}, {pipeline_mode = #tpu.pipeline_mode<synchronous>, transform_indices = @transform_1, window_bounds = array<i64: 8, 32>}, {pipeline_mode = #tpu.pipeline_mode<synchronous>, transform_indices = @transform_2, window_bounds = array<i64: 8, 32>}, {pipeline_mode = #tpu.pipeline_mode<synchronous>, transform_indices = @transform_3, window_bounds = array<i64: 1, 8, 4>}, {pipeline_mode = #tpu.pipeline_mode<synchronous>, transform_indices = @transform_4, window_bounds = array<i64: 52, 128>}, {pipeline_mode = #tpu.pipeline_mode<synchronous>, transform_indices = @transform_5, window_bounds = array<i64: 1, 128>}, {pipeline_mode = #tpu.pipeline_mode<synchronous>, transform_indices = @transform_6, window_bounds = array<i64: 32, 16>}, {pipeline_mode = #tpu.pipeline_mode<synchronous>, transform_indices = @transform_7, window_bounds = array<i64: 1, 16>}, {pipeline_mode = #tpu.pipeline_mode<synchronous>, transform_indices = @transform_8, window_bounds = array<i64: 1, 8, 16>}, {pipeline_mode = #tpu.pipeline_mode<synchronous>, transform_indices = @transform_9, window_bounds = array<i64: 8, 32>}, {pipeline_mode = #tpu.pipeline_mode<synchronous>, transform_indices = @transform_10, window_bounds = array<i64: 8, 32>}]} {
    %c0 = arith.constant 0 : index
    %c0_0 = arith.constant 0 : index
    %0 = vector.load %arg5[%c0, %c0_0] : memref<52x128xf32, #tpu.memory_space<vmem>>, vector<52x128xf32>
    %c0_1 = arith.constant 0 : index
    %c0_2 = arith.constant 0 : index
    %1 = vector.load %arg7[%c0_1, %c0_2] : memref<32x16xf32, #tpu.memory_space<vmem>>, vector<32x16xf32>
    %c0_3 = arith.constant 0 : index
    %c0_4 = arith.constant 0 : index
    %2 = vector.load %arg6[%c0_3, %c0_4] : memref<1x128xf32, #tpu.memory_space<vmem>>, vector<1x128xf32>
    %3 = vector.shape_cast %2 : vector<1x128xf32> to vector<1x128xf32>
    %4 = vector.broadcast %3 : vector<1x128xf32> to vector<8x128xf32>
    %c0_5 = arith.constant 0 : index
    %c0_6 = arith.constant 0 : index
    %5 = vector.load %arg8[%c0_5, %c0_6] : memref<1x16xf32, #tpu.memory_space<vmem>>, vector<1x16xf32>
    %6 = vector.shape_cast %5 : vector<1x16xf32> to vector<1x16xf32>
    %7 = vector.broadcast %6 : vector<1x16xf32> to vector<8x16xf32>
    %c0_7 = arith.constant 0 : index
    %c0_8 = arith.constant 0 : index
    %8 = vector.load %arg1[%c0_7, %c0_8] : memref<8x16xf32, #tpu.memory_space<vmem>>, vector<8x16xf32>
    %c0_9 = arith.constant 0 : index
    %c0_10 = arith.constant 0 : index
    %9 = vector.load %arg12[%c0_9, %c0_10] : memref<8x52xf32, #tpu.memory_space<vmem>>, vector<8x16xf32>
    tpu.vector_store %arg12[%c0_9, %c0_10], %8 {strides = array<i32>} : memref<8x52xf32, #tpu.memory_space<vmem>>, vector<8x16xf32>,
    %c0_11 = arith.constant 0 : index
    %c0_12 = arith.constant 0 : index
    %10 = vector.load %arg2[%c0_11, %c0_12] : memref<8x32xf32, #tpu.memory_space<vmem>>, vector<8x32xf32>
    %c0_13 = arith.constant 0 : index
    %c20 = arith.constant 20 : index
    %11 = vector.load %arg12[%c0_13, %c20] : memref<8x52xf32, #tpu.memory_space<vmem>>, vector<8x32xf32>
    tpu.vector_store %arg12[%c0_13, %c20], %10 {strides = array<i32>} : memref<8x52xf32, #tpu.memory_space<vmem>>, vector<8x32xf32>,
    %c0_14 = arith.constant 0 : index
    %c0_15 = arith.constant 0 : index
    %12 = vector.load %arg3[%c0_14, %c0_15] : memref<8x32xf32, #tpu.memory_space<vmem>>, vector<8x32xf32>
    %c0_16 = arith.constant 0 : index
    %c0_17 = arith.constant 0 : index
    %13 = vector.load %arg13[%c0_16, %c0_17] : memref<8x32xf32, #tpu.memory_space<vmem>>, vector<8x32xf32>
    tpu.vector_store %arg13[%c0_16, %c0_17], %12 {strides = array<i32>} : memref<8x32xf32, #tpu.memory_space<vmem>>, vector<8x32xf32>,
    %c0_i32 = arith.constant 0 : i32
    %14 = arith.index_cast %c0_i32 : i32 to index
    %c0_18 = arith.constant 0 : index
    %c0_19 = arith.constant 0 : index
    %15 = vector.load %arg4[%14, %c0_18, %c0_19] : memref<1x8x4xf32, #tpu.memory_space<vmem>>, vector<1x8x4xf32>
    %16 = vector.shape_cast %15 : vector<1x8x4xf32> to vector<8x4xf32>
    %c0_20 = arith.constant 0 : index
    %c16 = arith.constant 16 : index
    %17 = vector.load %arg12[%c0_20, %c16] : memref<8x52xf32, #tpu.memory_space<vmem>>, vector<8x4xf32>
    tpu.vector_store %arg12[%c0_20, %c16], %16 {strides = array<i32>} : memref<8x52xf32, #tpu.memory_space<vmem>>, vector<8x4xf32>,
    %c0_21 = arith.constant 0 : index
    %c0_22 = arith.constant 0 : index
    %18 = vector.load %arg12[%c0_21, %c0_22] : memref<8x52xf32, #tpu.memory_space<vmem>>, vector<8x52xf32>
    %cst = arith.constant dense<0.000000e+00> : vector<8x128xf32>
    %19 = tpu.matmul %18, %0, %cst {dimension_numbers = #tpu.dot_dimension_numbers<[1], [0], [0], [1], [0, 0, 1, 1], [], []>} : vector<8x52xf32>, vector<52x128xf32>, vector<8x128xf32> -> vector<8x128xf32>
    %20 = arith.addf %19, %4 : vector<8x128xf32>
    %21 = vector.extract_strided_slice %20 {offsets = [0, 0], sizes = [8, 96], strides = [1, 1]} : vector<8x128xf32> to vector<8x96xf32>
    %22 = arith.negf %21 : vector<8x96xf32>
    %23 = math.exp %22 : vector<8x96xf32>
    %cst_23 = arith.constant 1.000000e+00 : f32
    %24 = vector.broadcast %cst_23 : f32 to vector<8x96xf32>
    %25 = arith.addf %24, %23 : vector<8x96xf32>
    %26 = arith.divf %24, %25 : vector<8x96xf32>
    %27 = vector.extract_strided_slice %26 {offsets = [0, 0], sizes = [8, 32], strides = [1, 1]} : vector<8x96xf32> to vector<8x32xf32>
    %28 = vector.extract_strided_slice %26 {offsets = [0, 32], sizes = [8, 32], strides = [1, 1]} : vector<8x96xf32> to vector<8x32xf32>
    %29 = vector.extract_strided_slice %26 {offsets = [0, 64], sizes = [8, 32], strides = [1, 1]} : vector<8x96xf32> to vector<8x32xf32>
    %30 = vector.extract_strided_slice %20 {offsets = [0, 96], sizes = [8, 32], strides = [1, 1]} : vector<8x128xf32> to vector<8x32xf32>
    %31 = math.tanh %30 : vector<8x32xf32>
    %c0_24 = arith.constant 0 : index
    %c0_25 = arith.constant 0 : index
    %32 = vector.load %arg13[%c0_24, %c0_25] : memref<8x32xf32, #tpu.memory_space<vmem>>, vector<8x32xf32>
    %33 = arith.mulf %28, %32 : vector<8x32xf32>
    %34 = arith.mulf %27, %31 : vector<8x32xf32>
    %35 = arith.addf %33, %34 : vector<8x32xf32>
    %36 = math.tanh %35 : vector<8x32xf32>
    %37 = arith.mulf %29, %36 : vector<8x32xf32>
    %38 = vector.extract_strided_slice %18 {offsets = [0, 0], sizes = [8, 16], strides = [1, 1]} : vector<8x52xf32> to vector<8x16xf32>
    %cst_26 = arith.constant dense<0.000000e+00> : vector<8x16xf32>
    %39 = tpu.matmul %37, %1, %cst_26 {dimension_numbers = #tpu.dot_dimension_numbers<[1], [0], [0], [1], [0, 0, 1, 1], [], []>} : vector<8x32xf32>, vector<32x16xf32>, vector<8x16xf32> -> vector<8x16xf32>
    %40 = arith.addf %38, %39 : vector<8x16xf32>
    %41 = arith.addf %40, %7 : vector<8x16xf32>
    %42 = arith.index_cast %c0_i32 : i32 to index
    %c0_27 = arith.constant 0 : index
    %c0_28 = arith.constant 0 : index
    %43 = vector.load %arg9[%42, %c0_27, %c0_28] : memref<1x8x16xf32, #tpu.memory_space<vmem>>, vector<1x8x16xf32>
    %44 = vector.shape_cast %43 : vector<1x8x16xf32> to vector<8x16xf32>
    %45 = vector.shape_cast %41 : vector<8x16xf32> to vector<1x8x16xf32>
    tpu.vector_store %arg9[%42, %c0_27, %c0_28], %45 {strides = array<i32>} : memref<1x8x16xf32, #tpu.memory_space<vmem>>, vector<1x8x16xf32>,
    %c0_29 = arith.constant 0 : index
    %c0_30 = arith.constant 0 : index
    %46 = vector.load %arg13[%c0_29, %c0_30] : memref<8x32xf32, #tpu.memory_space<vmem>>, vector<8x32xf32>
    tpu.vector_store %arg13[%c0_29, %c0_30], %35 {strides = array<i32>} : memref<8x32xf32, #tpu.memory_space<vmem>>, vector<8x32xf32>,
    %c0_31 = arith.constant 0 : index
    %c20_32 = arith.constant 20 : index
    %47 = vector.load %arg12[%c0_31, %c20_32] : memref<8x52xf32, #tpu.memory_space<vmem>>, vector<8x32xf32>
    tpu.vector_store %arg12[%c0_31, %c20_32], %37 {strides = array<i32>} : memref<8x52xf32, #tpu.memory_space<vmem>>, vector<8x32xf32>,
    %c0_33 = arith.constant 0 : index
    %c0_34 = arith.constant 0 : index
    %48 = vector.load %arg12[%c0_33, %c0_34] : memref<8x52xf32, #tpu.memory_space<vmem>>, vector<8x16xf32>
    tpu.vector_store %arg12[%c0_33, %c0_34], %41 {strides = array<i32>} : memref<8x52xf32, #tpu.memory_space<vmem>>, vector<8x16xf32>,
    %c1_i32 = arith.constant 1 : i32
    %c0_35 = arith.constant 0 : index
    %c20_36 = arith.constant 20 : index
    %49 = vector.load %arg12[%c0_35, %c20_36] : memref<8x52xf32, #tpu.memory_space<vmem>>, vector<8x32xf32>
    %c0_37 = arith.constant 0 : index
    %c0_38 = arith.constant 0 : index
    %50 = vector.load %arg10[%c0_37, %c0_38] : memref<8x32xf32, #tpu.memory_space<vmem>>, vector<8x32xf32>
    tpu.vector_store %arg10[%c0_37, %c0_38], %49 {strides = array<i32>} : memref<8x32xf32, #tpu.memory_space<vmem>>, vector<8x32xf32>,
    %c0_39 = arith.constant 0 : index
    %c0_40 = arith.constant 0 : index
    %51 = vector.load %arg13[%c0_39, %c0_40] : memref<8x32xf32, #tpu.memory_space<vmem>>, vector<8x32xf32>
    %c0_41 = arith.constant 0 : index
    %c0_42 = arith.constant 0 : index
    %52 = vector.load %arg11[%c0_41, %c0_42] : memref<8x32xf32, #tpu.memory_space<vmem>>, vector<8x32xf32>
    tpu.vector_store %arg11[%c0_41, %c0_42], %51 {strides = array<i32>} : memref<8x32xf32, #tpu.memory_space<vmem>>, vector<8x32xf32>,
    return
  }
  func.func @transform_0(%arg0: i32) -> (i32, i32) {
    %c0_i32 = arith.constant 0 : i32
    %c0_i32_0 = arith.constant 0 : i32
    %c0_i32_1 = arith.constant 0 : i32
    return %c0_i32, %c0_i32_0 : i32, i32
  }
  func.func @transform_1(%arg0: i32) -> (i32, i32) {
    %c0_i32 = arith.constant 0 : i32
    %c0_i32_0 = arith.constant 0 : i32
    %c0_i32_1 = arith.constant 0 : i32
    return %c0_i32, %c0_i32_0 : i32, i32
  }
  func.func @transform_2(%arg0: i32) -> (i32, i32) {
    %c0_i32 = arith.constant 0 : i32
    %c0_i32_0 = arith.constant 0 : i32
    %c0_i32_1 = arith.constant 0 : i32
    return %c0_i32, %c0_i32_0 : i32, i32
  }
  func.func @transform_3(%arg0: i32) -> (i32, i32, i32) {
    %c0_i32 = arith.constant 0 : i32
    %c0_i32_0 = arith.constant 0 : i32
    %c0_i32_1 = arith.constant 0 : i32
    %c0_i32_2 = arith.constant 0 : i32
    return %c0_i32, %c0_i32_0, %c0_i32_1 : i32, i32, i32
  }
  func.func @transform_4(%arg0: i32) -> (i32, i32) {
    %c0_i32 = arith.constant 0 : i32
    %c0_i32_0 = arith.constant 0 : i32
    %c0_i32_1 = arith.constant 0 : i32
    return %c0_i32, %c0_i32_0 : i32, i32
  }
  func.func @transform_5(%arg0: i32) -> (i32, i32) {
    %c0_i32 = arith.constant 0 : i32
    %c0_i32_0 = arith.constant 0 : i32
    %c0_i32_1 = arith.constant 0 : i32
    return %c0_i32, %c0_i32_0 : i32, i32
  }
  func.func @transform_6(%arg0: i32) -> (i32, i32) {
    %c0_i32 = arith.constant 0 : i32
    %c0_i32_0 = arith.constant 0 : i32
    %c0_i32_1 = arith.constant 0 : i32
    return %c0_i32, %c0_i32_0 : i32, i32
  }
  func.func @transform_7(%arg0: i32) -> (i32, i32) {
    %c0_i32 = arith.constant 0 : i32
    %c0_i32_0 = arith.constant 0 : i32
    %c0_i32_1 = arith.constant 0 : i32
    return %c0_i32, %c0_i32_0 : i32, i32
  }
  func.func @transform_8(%arg0: i32) -> (i32, i32, i32) {
    %c0_i32 = arith.constant 0 : i32
    %c0_i32_0 = arith.constant 0 : i32
    %c0_i32_1 = arith.constant 0 : i32
    %c0_i32_2 = arith.constant 0 : i32
    return %c0_i32, %c0_i32_0, %c0_i32_1 : i32, i32, i32
  }
  func.func @transform_9(%arg0: i32) -> (i32, i32) {
    %c0_i32 = arith.constant 0 : i32
    %c0_i32_0 = arith.constant 0 : i32
    %c0_i32_1 = arith.constant 0 : i32
    return %c0_i32, %c0_i32_0 : i32, i32
  }
  func.func @transform_10(%arg0: i32) -> (i32, i32) {
    %c0_i32 = arith.constant 0 : i32
    %c0_i32_0 = arith.constant 0 : i32
    %c0_i32_1 = arith.constant 0 : i32
    return %c0_i32, %c0_i32_0 : i32, i32
  }
}

</mosaic_0001>

<bundles_post_ra>
// kernel: tpu_custom_call.1
= control target key start
LH: loop header
LB: loop body
LE: loop exit
PB: predicated region body
PF: predicated region fallthrough
CT: control target
= control target key end

     0   :  { %16 = vsyncpa [#allocation5], 0  ;;  %s511_s0 = inlined_call_operand.vmem [shape: f32[8,16], index: 0, kind: input, shape index: {}]   ;;  %s512_s1 = inlined_call_operand.vmem [shape: f32[8,32], index: 1, kind: input, shape index: {}]   ;;  %s513_s2 = inlined_call_operand.vmem [shape: f32[8,32], index: 2, kind: input, shape index: {}]   ;;  %s514_s3 = inlined_call_operand.vmem [shape: f32[1,8,4], index: 3, kind: input, shape index: {}]   ;;  %s515_s4 = inlined_call_operand.hbm [shape: f32[52,128], index: 4, kind: input, shape index: {}]   ;;  %s516_s5 = inlined_call_operand.vmem [shape: f32[1,128], index: 5, kind: input, shape index: {}]   ;;  %s517_s6 = inlined_call_operand.vmem [shape: f32[32,16], index: 6, kind: input, shape index: {}]   ;;  %s518_s7 = inlined_call_operand.vmem [shape: f32[1,16], index: 7, kind: input, shape index: {}]   ;;  %s519_s8 = inlined_call_operand.hbm [shape: f32[1,8,16], index: 8, kind: output, shape index: {0}]   ;;  %s520_s9 = inlined_call_operand.hbm [shape: f32[8,32], index: 9, kind: output, shape index: {1}]   ;;  %s521_s10 = inlined_call_operand.hbm [shape: f32[8,32], index: 10, kind: output, shape index: {2}]  }
   0x1   :  { %17 = vsyncpa [#allocation6], 0 }
   0x2   :  { %18 = vsyncpa [#allocation9], 0  ;;  %s31_s15 = sshll.u32 %s515_s4, 4  ;;  %s383_s16 = smov [#allocation4]   ;;  %s32_s15 = int_to_ptr.hbm [resolvable:$true] %s31_s15 }
   0x3   :  { %s33_s17 = sshll.u32 %s383_s16, 4  ;;  %s384_s18 = smov 128   ;;  %s34_s17 = int_to_ptr.vmem [resolvable:$true] %s33_s17 }
   0x4   :  { %s385_s19 = smov 8  }
   0x5   :  { %39 = dma.hbm_to_vmem [thread:$0]  %s32_s15, 896, %s34_s17, [#allocation5], %s384_s18, %s384_s18, %s385_s19  }
   0x6   :  { %377 = dma.done.wait [#allocation5], 896  }
   0x7   :  { %378 = vsyncadd [#allocation5], 4294966400  ;;  %v72_v0 = vld [vmem:[%s512_s1] sm:$0xff]  ;;  %s386_s22 = smov 20   ;;  %s387_s4 = smov 16   ;;  %vm70_vm0 = vcmask 130048  }
   0x8   :  { %74 = vrot.lane.b32.xlu0 %v72_v0, %s386_s22  ;;  %v82_v1 = vld [vmem:[%s514_s3] sm:$0xff]  ;;  %vm94_vm1 = vcmask 1043456   ;;  %v55_v4 = vld [vmem:[#allocation4 + $0x28] sm:$0xff]  ;;  %v54_v5 = vld [vmem:[#allocation4 + $0x20] sm:$0xff]  ;;  %vm77_vm2 = vcmask 425120   ;;  %vm87_vm3 = vcmask 162944  }
   0x9   :  { %v69_v2 = vld [vmem:[%s511_s0] sm:$0xff]  ;;  %v53_v6 = vld [vmem:[#allocation4 + $0x18] sm:$0xff]  ;;  %v51_v8 = vld [vmem:[#allocation4 + $0x8] sm:$0xff]  ;;  %vm90_vm4 = vcmask 424960   ;;  %vm80_vm5 = vcmask 261120   ;;  %s388_s28 = smov 32  }
   0xa   :  { %71 = vst.msk [vmem:[#allocation2] sm:$0xff] %vm70_vm0, %v69_v2  ;;  %v56_v3 = vld [vmem:[#allocation4 + $0x30] sm:$0xf]  ;;  %v50_v9 = vld [vmem:[#allocation4] sm:$0xff]  ;;  %v60_v39 = vld [vmem:[%s517_s6 + $0x18] sm:$0xff]  ;;  %s390_s16 = smov 84  }
   0xb   :  { %254 = vmatpush.msk.msra.mxu0 %vm94_vm1, %v56_v3  ;;  %v52_v7 = vld [vmem:[#allocation4 + $0x10] sm:$0xff]  ;;  %v59_v40 = vld [vmem:[%s517_s6 + $0x10] sm:$0xff]  ;;  %177 = vmatpush.msra.mxu1 %v60_v39  ;;  %v58_v41 = vld [vmem:[%s517_s6 + $0x8] sm:$0xff]  ;;  %s391_s17 = smov 64   ;;  %s213_s21 = sshll.u32 %s519_s8, 4  ;;  %s214_s21 = int_to_ptr.hbm [resolvable:$true] %s213_s21 }
   0xc   :  { %v79_v13 = vld [vmem:[%s513_s2] sm:$0xff]  ;;  %s389_s2 = smov 96   ;;  %s392_s22 = smov [#allocation7]  }
   0xd   :  { %108 = vmatpush.msra.mxu0 %v55_v4  ;;  %81 = vst.msk [vmem:[#allocation3] sm:$0xff] %vm80_vm5, %v79_v13  ;;  %v271_v14 = vld [vmem:[%s516_s5] ss:$0 sm:$0xff]  ;;  %178 = vmatpush.msra.mxu1 %v59_v40  ;;  %s211_s23 = sshll.u32 %s392_s22, 4  ;;  %s393_s24 = smov 108   ;;  %s212_s23 = int_to_ptr.vmem [resolvable:$true] %s211_s23 }
   0xe   :  { %v57_v42 = vld [vmem:[%s517_s6] sm:$0xff]  ;;  %s224_s0 = sshll.u32 %s520_s9, 4  ;;  %s395_s8 = smov [#allocation10]   ;;  %s225_s0 = int_to_ptr.hbm [resolvable:$true] %s224_s0 }
   0xf   :  { %109 = vmatpush.msra.mxu0 %v54_v5  ;;  %179 = vmatpush.msra.mxu1 %v58_v41  ;;  %v272_v49 = vld [vmem:[%s518_s7] ss:$0 sm:$0xff]  ;;  %s394_s7 = smov [#allocation8]   ;;  %s233_s1 = sshll.u32 %s395_s8, 4  ;;  %s234_s1 = int_to_ptr.vmem [resolvable:$true] %s233_s1 }
  0x10   :  { %84 = vrot.lane.b32.xlu0 %v82_v1, %s387_s4  ;;  %s222_s4 = sshll.u32 %s394_s7, 4  ;;  %s223_s4 = int_to_ptr.vmem [resolvable:$true] %s222_s4 }
  0x11   :  { %110 = vmatpush.msra.mxu0 %v53_v6  ;;  %180 = vmatpush.msra.mxu1 %v57_v42 }
  0x13   :  { %111 = vmatpush.msra.mxu0 %v52_v7 }
  0x14   :  { %v138_v18 = vld [vmem:[#allocation3] sm:$0xff] }
  0x15   :  { %112 = vmatpush.msra.mxu0 %v51_v8 }
  0x17   :  { %113 = vmatpush.msra.mxu0 %v50_v9 }
  0x7a   :  { %v75_v10 = vpop.permute.xlu0 %74 }
  0x7b   :  { %78 = vst.msk [vmem:[#allocation2] sm:$0xff] %vm77_vm2, %v75_v10 }
  0x82   :  { %v85_v11 = vpop.permute.xlu0 %84 }
  0x83   :  { %88 = vst.msk [vmem:[#allocation2] sm:$0xff] %vm87_vm3, %v85_v11 }
  0x8a   :  { %v465_v12 = vld [vmem:[#allocation2] sm:$0xff] }
  0x8b   :  { %255 = vmatmul.msk.f32.vlgmr.msra.gmra.mxu0 %vm90_vm4, %v465_v12 }
 0x108   :  { %v115_v15 = vpop.f32.mrf.mxu0 }
 0x109   :  { %v116_v16 = vadd.f32 %v271_v14, %v115_v15 }
 0x10b   :  { %273 = vtanh.f32 %v116_v16  ;;  %v256_v19 = vmul.f32 -1.442695, %v116_v16 }
 0x10d   :  { %275 = vpow2.f32 %v256_v19 }
 0x111   :  { %v274_v17 = vpop.eup %273 }
 0x112   :  { %145 = vrot.lane.b32.xlu1 %v274_v17, %s388_s28 }
 0x113   :  { %v276_v20 = vpop.eup %275 }
 0x114   :  { %v121_v21 = vadd.f32 1.0, %v276_v20 }
 0x116   :  { %277 = vrcp.f32 %v121_v21  ;;  %v133_v27 = vand.u32 2147483648, %v121_v21  ;;  %vm127_vm7 = vweird.f32 %v121_v21  ;;  %v131_v28 = vand.u32 2147483647, %v121_v21 }
 0x118   :  { %v134_v30 = vor.u32 1.1754944e-38, %v133_v27  ;;  %vm132_vm9 = vcmp.eq.f32.partialorder %v131_v28, 8.507059e+37 }
 0x11a   :  { %140 = vrot.lane.b32.xlu1 %v138_v18, %s388_s28 }
 0x11c   :  { %v278_v22 = vpop.eup %277 }
 0x11d   :  { %v123_v23 = vmul.f32 %v278_v22, %v121_v21  ;;  %vm128_vm6 = vweird.f32 %v278_v22 }
 0x11e   :  { %vm129_vm8 = vmor %vm127_vm7, %vm128_vm6 }
 0x11f   :  { %v124_v24 = vsub.f32 1.0, %v123_v23 }
 0x121   :  { %v125_v25 = vmul.f32 %v278_v22, %v124_v24 }
 0x123   :  { %v126_v26 = vadd.f32 %v278_v22, %v125_v25 }
 0x125   :  { %v130_v29 = vsel %vm129_vm8, %v278_v22, %v126_v26 }
 0x126   :  { %v135_v32 = vsel %vm132_vm9, %v134_v30, %v130_v29 }
 0x184   :  { %v146_v31 = vpop.permute.xlu1 %145 }
 0x185   :  { %v148_v33 = vmul.f32 %v146_v31, %v135_v32 }
 0x187   :  { %150 = vrot.lane.b32.xlu2 %v148_v33, %s388_s28 }
 0x18c   :  { %v141_v34 = vpop.permute.xlu1 %140 }
 0x18d   :  { %v143_v35 = vmul.f32 %v141_v34, %v135_v32 }
 0x1e1   :  { %v151_v36 = vpop.permute.xlu2 %150 }
 0x1e2   :  { %v153_v37 = vadd.f32 %v151_v36, %v143_v35 }
 0x1e4   :  { %279 = vtanh.f32 %v153_v37 }
 0x1ea   :  { %v280_v38 = vpop.eup %279 }
 0x1eb   :  { %156 = vrot.lane.b32.xlu2 %v280_v38, %s388_s28  ;;  %s235_s28 = sshll.u32 %s521_s10, 4  ;;  %s236_s28 = int_to_ptr.hbm [resolvable:$true] %s235_s28 }
 0x1f3   :  { %189 = vrot.lane.b32.xlu2 %v153_v37, %s389_s2 }
 0x245   :  { %v157_v43 = vpop.permute.xlu2 %156 }
 0x246   :  { %v159_v44 = vmul.f32 %v157_v43, %v135_v32 }
 0x248   :  { %193 = vrot.lane.b32.xlu1 %v159_v44, %s390_s16  ;;  %161 = vrot.lane.b32.xlu0 %v159_v44, %s391_s17 }
 0x24d   :  { %v190_v45 = vpop.permute.xlu2 %189 }
 0x24e   :  { %192 = vst.msk [vmem:[#allocation3] sm:$0xff] %vm80_vm5, %v190_v45 }
 0x255   :  { %v204_v46 = vld [vmem:[#allocation3] sm:$0xff] }
 0x256   :  { %205 = vst.msk [vmem:[#allocation10] sm:$0xff] %vm80_vm5, %v204_v46 }
 0x2ba   :  { %v194_v47 = vpop.permute.xlu1 %193  ;;  %v162_v48 = vpop.permute.xlu0 %161 }
 0x2bb   :  { %196 = vst.msk [vmem:[#allocation2] sm:$0xff] %vm77_vm2, %v194_v47  ;;  %257 = vmatmul.msk.f32.vlgmr.msra.gmra.mxu1 %vm80_vm5, %v162_v48 }
 0x338   :  { %v182_v50 = vpop.f32.mrf.mxu1 }
 0x339   :  { %v185_v51 = vadd.f32 %v182_v50, %v465_v12 }
 0x33b   :  { %v186_v52 = vadd.f32 %v272_v49, %v185_v51 }
 0x33d   :  { %197 = vst.msk [vmem:[#allocation2] sm:$0xff] %vm70_vm0, %v186_v52 }
 0x33e   :  { %187 = vst.msk [vmem:[#allocation7] sm:$0xff] %vm70_vm0, %v186_v52 }
 0x33f   :  { %216 = dma.vmem_to_hbm [thread:$0]  %s212_s23, 128, %s214_s21, [#allocation6]  }
 0x344   :  { %v198_v53 = vld [vmem:[#allocation2] sm:$0xff] }
 0x345   :  { %200 = vrot.lane.b32.xlu0 %v198_v53, %s393_s24 }
 0x3b7   :  { %v201_v54 = vpop.permute.xlu0 %200 }
 0x3b8   :  { %203 = vst.msk [vmem:[#allocation8] sm:$0xff] %vm80_vm5, %v201_v54 }
 0x3b9   :  { %227 = dma.vmem_to_hbm [thread:$0]  %s223_s4, 128, %s225_s0, [#allocation9]  }
 0x3ba   :  { %238 = dma.vmem_to_hbm [thread:$0]  %s234_s1, 128, %s236_s28, [#allocation9]  }
 0x3bb   :  { %379 = dma.done.wait [#allocation6], 128  }
 0x3bc   :  { %380 = vsyncadd [#allocation6], 4294967168 }
 0x3bd   :  { %381 = dma.done.wait [#allocation9], 256  }
 0x3be   :  { %382 = vsyncadd [#allocation9], 4294967040 }
 0x3bf   :  { %251 = vsyncpa [#allocation5], 1 }
 0x3c0   :  { %252 = vsyncpa [#allocation6], 1 }
 0x3c1   :  { %253 = vsyncpa [#allocation9], 1 }

</bundles_post_ra>
